<compile_context>
chip_gen: v5e
topology: v5e:2x2
jax: 0.10.0
libtpu: 0.0.40
codegen_flags: <defaults>
</compile_context>

<pallas_src>
import jax
import jax.numpy as jnp
from jax import lax
from jax.experimental import pallas as pl
from jax.experimental.pallas import tpu as pltpu


# ---------------------------------------------------------------------------
# Helpers
# ---------------------------------------------------------------------------
def _round_up(x, m):
    return ((x + m - 1) // m) * m


def _largest_divisor(n, cap, multiple):
    """Largest multiple of `multiple` that divides n and is <= cap."""
    cap = max(multiple, (min(cap, n) // multiple) * multiple)
    for cand in range(cap, multiple - 1, -multiple):
        if n % cand == 0:
            return cand
    return multiple


def _rowgroup_sum(x):
    """Reduce an (R, C) f32 block (R a static multiple of 8) to (8, C)."""
    rows = x.shape[0]
    acc = x[0:8, :]
    for r in range(1, rows // 8):
        acc = acc + x[r * 8:(r + 1) * 8, :]
    return acc


# ---------------------------------------------------------------------------
# Kernels
# ---------------------------------------------------------------------------
def _pairwise_kernel(t_col_ref, xi_ref, vi_ref, xj_ref, tj_ref, vj_ref, o_ref):
    # grid = (num_i_tiles, num_j_tiles); j is the reduction axis.
    j = pl.program_id(1)

    @pl.when(j == 0)
    def _init():
        o_ref[...] = jnp.zeros_like(o_ref)

    tm = xi_ref.shape[1]

    # sigmoid only on the O(TM)+O(TN) row vectors (EUP, otherwise idle).
    p_i = jax.nn.sigmoid(xi_ref[...].astype(jnp.float32))       # (1, TM)
    p_j = jax.nn.sigmoid(xj_ref[...].astype(jnp.float32))       # (1, TN)
    v_i = vi_ref[...]                                            # (1, TM)
    v_j = vj_ref[...]                                            # (1, TN)
    vp_i = v_i * p_i

    # i-tile scalars for the rank-1 distance part (O(TM) work).
    n_valid = jnp.sum(v_i)
    s_p = jnp.sum(vp_i)
    s_p2 = jnp.sum(vp_i * p_i)

    # Exact label-mismatch indicator (any label values); the ONLY O(TM*TN)
    # element-wise work left (~2 VALU ops/element).
    mism = (t_col_ref[...] != tj_ref[...]).astype(jnp.float32)   # (TM, TN)

    # Row reductions on the (otherwise idle) MXU:
    #   row 0: C_j = sum_i v_i * m_ij
    #   row 1: D_j = sum_i v_i * p_i * m_ij
    ridx = lax.broadcasted_iota(jnp.int32, (8, tm), 0)
    lhs = jnp.where(ridx == 0, jnp.broadcast_to(v_i, (8, tm)),
                    jnp.where(ridx == 1, jnp.broadcast_to(vp_i, (8, tm)), 0.0))
    cd = jnp.dot(lhs, mism, preferred_element_type=jnp.float32)  # (8, TN)
    c = cd[0:1, :]
    d = cd[1:2, :]

    # sum_i [(p_j-p_i)^2 + m_ij*(1 - 2*(p_j-p_i))]
    #   = Nv*p_j^2 - 2*p_j*S_p + S_p2 + (1-2*p_j)*C_j + 2*D_j
    poly = (n_valid * p_j - 2.0 * s_p) * p_j + s_p2              # (1, TN)
    partial = (poly + (1.0 - 2.0 * p_j) * c + 2.0 * d) * v_j     # (1, TN)

    o_ref[0:1, :] += partial                                     # acc across j


def _bce_sum_kernel(x_ref, y_ref, o_ref):
    x = x_ref[...].astype(jnp.float32)           # (TR, C) dense slab
    y = y_ref[...].astype(jnp.float32)
    # numerically stable BCE-with-logits: max(x,0) - x*y + log1p(exp(-|x|)).
    # Padded elements (x = -1e4, y = 0) contribute exactly 0 -> no mask needed.
    per = jnp.maximum(x, 0.0) - x * y + jnp.log1p(jnp.exp(-jnp.abs(x)))
    o_ref[...] = _rowgroup_sum(per)              # per-block (8, C) partial


# ---------------------------------------------------------------------------
# Branch wrappers
# ---------------------------------------------------------------------------
_BCE_LANES = 512          # lane width of the BCE slab (multiple of 128)
_BCE_MAX_ROWS = 256       # max sublane rows per BCE tile (multiple of 8)


def _bce_with_logits_mean(y_pred, y_true):
    n = y_pred.size
    rows_needed = -(-n // _BCE_LANES)
    tr = min(_BCE_MAX_ROWS, _round_up(rows_needed, 8))
    rows_pad = _round_up(rows_needed, tr)
    n_pad = rows_pad * _BCE_LANES
    num_blocks = rows_pad // tr

    # pad so padded elements contribute exactly 0 to the sum
    x = jnp.pad(y_pred.reshape(-1), (0, n_pad - n), constant_values=-1e4)
    y = jnp.pad(y_true.reshape(-1), (0, n_pad - n))
    x = x.reshape(rows_pad, _BCE_LANES)
    y = y.reshape(rows_pad, _BCE_LANES)

    partials = pl.pallas_call(
        _bce_sum_kernel,
        out_shape=jax.ShapeDtypeStruct((num_blocks * 8, _BCE_LANES), jnp.float32),
        grid=(num_blocks,),
        in_specs=[pl.BlockSpec((tr, _BCE_LANES), lambda g: (g, 0)),
                  pl.BlockSpec((tr, _BCE_LANES), lambda g: (g, 0))],
        out_specs=pl.BlockSpec((8, _BCE_LANES), lambda g: (g, 0)),
        compiler_params=pltpu.CompilerParams(
            dimension_semantics=("parallel",)),
    )(x, y)
    return jnp.sum(partials) / n


def _pairwise_tile_config():
    """(tm_cap, tn_cap, vmem_limit) gated on VMEM capacity (v7x has 64 MiB)."""
    vmem_bytes = 64 * 1024 * 1024
    try:
        vmem_bytes = int(pltpu.get_tpu_info().vmem_capacity_bytes)
    except Exception:
        pass
    if vmem_bytes >= 96 * 1024 * 1024:            # v5e / v6e: 128 MiB VMEM
        return 1024, 2048, 64 * 1024 * 1024
    return 1024, 1024, 40 * 1024 * 1024           # v7x: 64 MiB VMEM


def _pairwise_contrastive_sum(y_pred, y_true):
    n = y_pred.size
    tm_cap, tn_cap, vmem_limit = _pairwise_tile_config()

    n_pad = _round_up(n, 128)
    tn = _largest_divisor(n_pad, tn_cap, 128)
    if n_pad >= 256:
        # keep >=2 row tiles so both v7x TensorCores get work on the i axis
        tm = _largest_divisor(n_pad, min(tm_cap, n_pad // 2), 128)
    else:
        tm = n_pad
    ni, nj = n_pad // tm, n_pad // tn

    x_flat = jnp.pad(y_pred.reshape(-1), (0, n_pad - n))
    t_flat = jnp.pad(y_true.reshape(-1).astype(jnp.float32), (0, n_pad - n))
    valid = (jnp.arange(n_pad) < n).astype(jnp.float32)

    x_row = x_flat.reshape(1, n_pad)
    t_row = t_flat.reshape(1, n_pad)
    v_row = valid.reshape(1, n_pad)
    t_col = t_flat.reshape(n_pad, 1)

    col_i = pl.BlockSpec((tm, 1), lambda i, j: (i, 0))    # labels as a column
    row_i = pl.BlockSpec((1, tm), lambda i, j: (0, i))    # i-tile row vectors
    row_j = pl.BlockSpec((1, tn), lambda i, j: (0, j))    # j-tile row vectors

    partials = pl.pallas_call(
        _pairwise_kernel,
        out_shape=jax.ShapeDtypeStruct((ni * 8, tn), jnp.float32),
        grid=(ni, nj),
        in_specs=[col_i, row_i, row_i, row_j, row_j, row_j],
        out_specs=pl.BlockSpec((8, tn), lambda i, j: (i, 0)),
        compiler_params=pltpu.CompilerParams(
            dimension_semantics=("parallel", "arbitrary"),
            vmem_limit_bytes=vmem_limit),
    )(t_col, x_row, v_row, x_row, t_row, v_row)

    # tiny (ni*8, tn) partial slab -> scalar; reduce outside the kernel.
    return jnp.sum(partials)


# ---------------------------------------------------------------------------
# Public wrapper (matches ContrastiveLossOptimized.forward)
# ---------------------------------------------------------------------------
def contrastive_loss_optimized(y_pred, y_true, epoch, margin=1.0):
    """JAX/Pallas port of ContrastiveLossOptimized.forward (epoch: Python int)."""
    assert y_pred.shape == y_true.shape
    del margin  # unused by the reference forward pass
    # TODO(synk): the reference forward also does print(loss) on the contrastive
    # branch; intentionally omitted (host-side side effect).
    if epoch < 5:
        return _bce_with_logits_mean(y_pred, y_true)
    return _pairwise_contrastive_sum(y_pred, y_true)


# ---------------------------------------------------------------------------
# Pure-JAX references (for correctness check)
# ---------------------------------------------------------------------------
def _ref_bce(y_pred, y_true):
    x = y_pred.reshape(-1).astype(jnp.float32)
    y = y_true.reshape(-1).astype(jnp.float32)
    per = jnp.maximum(x, 0.0) - x * y + jnp.log1p(jnp.exp(-jnp.abs(x)))
    return jnp.mean(per)


def _ref_contrastive(y_pred, y_true):
    p = jax.nn.sigmoid(y_pred.reshape(-1).astype(jnp.float32))
    t = y_true.reshape(-1).astype(jnp.float32)
    dist = p[None, :] - p[:, None]
    ind = (t[None, :] != t[:, None]).astype(jnp.float32)
    loss = (1.0 - ind) * dist**2 + ind * (1.0 - dist) ** 2
    return jnp.sum(loss)


# ---------------------------------------------------------------------------
# Demo
# ---------------------------------------------------------------------------
if __name__ == "__main__":
    key = jax.random.PRNGKey(0)

    # (8,16): N=128 single j-tile, no padding.  (7,13): ragged N=91 -> masks.
    # (16,160): N=2560 -> multi-tile grid with accumulation + parallel i axis.
    for idx, shape in enumerate([(8, 16), (7, 13), (16, 160)]):
        kp, kt = jax.random.split(jax.random.fold_in(key, idx))
        y_pred = jax.random.normal(kp, shape, dtype=jnp.float32)
        y_true = jax.random.bernoulli(kt, 0.5, shape).astype(jnp.float32)

        loss_bce = jax.block_until_ready(
            contrastive_loss_optimized(y_pred, y_true, epoch=1))
        loss_con = jax.block_until_ready(
            contrastive_loss_optimized(y_pred, y_true, epoch=10))

        ref_bce = _ref_bce(y_pred, y_true)
        ref_con = _ref_contrastive(y_pred, y_true)

        assert jnp.allclose(loss_bce, ref_bce, rtol=1e-5, atol=1e-5), (
            shape, float(loss_bce), float(ref_bce))
        assert jnp.allclose(loss_con, ref_con, rtol=1e-3, atol=1e-2), (
            shape, float(loss_con), float(ref_con))

    print("KERNEL_OK")
</pallas_src>

<mosaic_0001>
module attributes {stable_mosaic.version = 11 : i64} {
  func.func @_bce_sum_kernel(%arg0: i32, %arg1: memref<8x512xf32, #tpu.memory_space<vmem>>, %arg2: memref<8x512xf32, #tpu.memory_space<vmem>>, %arg3: memref<8x512xf32, #tpu.memory_space<vmem>>) attributes {dimension_semantics = [#tpu.dimension_semantics<parallel>], iteration_bounds = array<i64: 1>, scalar_prefetch = 0 : i64, scratch_operands = 0 : i64, tpu.core_type = #tpu.core_type<tc>, window_params = [{transform_indices = @transform_0, window_bounds = array<i64: 8, 512>}, {transform_indices = @transform_1, window_bounds = array<i64: 8, 512>}, {transform_indices = @transform_2, window_bounds = array<i64: 8, 512>}]} {
    %c0 = arith.constant 0 : index
    %c0_0 = arith.constant 0 : index
    %0 = vector.load %arg1[%c0, %c0_0] : memref<8x512xf32, #tpu.memory_space<vmem>>, vector<8x512xf32>
    %c0_1 = arith.constant 0 : index
    %c0_2 = arith.constant 0 : index
    %1 = vector.load %arg2[%c0_1, %c0_2] : memref<8x512xf32, #tpu.memory_space<vmem>>, vector<8x512xf32>
    %cst = arith.constant 0.000000e+00 : f32
    %2 = vector.broadcast %cst : f32 to vector<8x512xf32>
    %3 = arith.maximumf %0, %2 : vector<8x512xf32>
    %4 = arith.mulf %0, %1 : vector<8x512xf32>
    %5 = arith.subf %3, %4 : vector<8x512xf32>
    %6 = math.absf %0 : vector<8x512xf32>
    %cst_3 = arith.constant 0.000000e+00 : f32
    %7 = vector.broadcast %cst_3 : f32 to vector<8x512xf32>
    %8 = arith.subf %7, %6 : vector<8x512xf32>
    %9 = math.exp %8 : vector<8x512xf32>
    %10 = math.log1p %9 : vector<8x512xf32>
    %11 = arith.addf %5, %10 : vector<8x512xf32>
    %c0_4 = arith.constant 0 : index
    %c0_5 = arith.constant 0 : index
    %12 = vector.load %arg3[%c0_4, %c0_5] : memref<8x512xf32, #tpu.memory_space<vmem>>, vector<8x512xf32>
    tpu.vector_store %arg3[%c0_4, %c0_5], %11 {strides = array<i32>} : memref<8x512xf32, #tpu.memory_space<vmem>>, vector<8x512xf32>,
    return
  }
  func.func @transform_0(%arg0: i32) -> (i32, i32) {
    %c0_i32 = arith.constant 0 : i32
    %c0_i32_0 = arith.constant 0 : i32
    return %arg0, %c0_i32 : i32, i32
  }
  func.func @transform_1(%arg0: i32) -> (i32, i32) {
    %c0_i32 = arith.constant 0 : i32
    %c0_i32_0 = arith.constant 0 : i32
    return %arg0, %c0_i32 : i32, i32
  }
  func.func @transform_2(%arg0: i32) -> (i32, i32) {
    %c0_i32 = arith.constant 0 : i32
    %c0_i32_0 = arith.constant 0 : i32
    return %arg0, %c0_i32 : i32, i32
  }
}

</mosaic_0001>

<bundles_post_ra>
// kernel: tpu_custom_call.1
= control target key start
LH: loop header
LB: loop body
LE: loop exit
PB: predicated region body
PF: predicated region fallthrough
CT: control target
= control target key end

     0   :  { %7 = vsyncpa [#allocation3], 0  ;;  %s289_s0 = inlined_call_operand.hbm [shape: f32[8,512], index: 0, kind: input, shape index: {}]   ;;  %s290_s1 = inlined_call_operand.hbm [shape: f32[8,512], index: 1, kind: input, shape index: {}]   ;;  %s291_s2 = inlined_call_operand.hbm [shape: f32[8,512], index: 2, kind: output, shape index: {}]  }
   0x1   :  { %8 = vsyncpa [#allocation6], 0 }
   0x2   :  { %9 = vsyncpa [#allocation4], 0  ;;  %s15_s11 = sshll.u32 %s289_s0, 4  ;;  %s235_s12 = smov [#allocation2]   ;;  %s16_s11 = int_to_ptr.hbm [resolvable:$true] %s15_s11 }
   0x3   :  { %s17_s13 = sshll.u32 %s235_s12, 4  ;;  %s26_s16 = sshll.u32 %s290_s1, 4  ;;  %s18_s13 = int_to_ptr.vmem [resolvable:$true] %s17_s13  ;;  %s27_s16 = int_to_ptr.hbm [resolvable:$true] %s26_s16 }
   0x4   :  { %20 = dma.hbm_to_vmem [thread:$0]  %s16_s11, 512, %s18_s13, [#allocation3]  }
   0x5   :  { %s236_s17 = smov [#allocation5]  }
   0x6   :  { %s28_s18 = sshll.u32 %s236_s17, 4  ;;  %s29_s18 = int_to_ptr.vmem [resolvable:$true] %s28_s18 }
   0x7   :  { %31 = dma.hbm_to_vmem [thread:$0]  %s27_s16, 512, %s29_s18, [#allocation6]  }
   0x8   :  { %229 = dma.done.wait [#allocation3], 512  }
   0x9   :  { %230 = vsyncadd [#allocation3], 4294966784 }
   0xa   :  { %231 = dma.done.wait [#allocation6], 512  }
   0xb   :  { %232 = vsyncadd [#allocation6], 4294966784  ;;  %v40_v0 = vld [vmem:[#allocation2] sm:$0xff]  ;;  %v259_v1 = vld [vmem:[#allocation2 + $0x8] sm:$0xff]  ;;  %s237_s0 = smov [#allocation7]   ;;  %s127_s21 = sshll.u32 %s291_s2, 4  ;;  %s128_s21 = int_to_ptr.hbm [resolvable:$true] %s127_s21 }
   0xc   :  { %v60_v2 = vand.u32 2147483647, %v40_v0  ;;  %v261_v3 = vld [vmem:[#allocation2 + $0x10] sm:$0xff]  ;;  %v61_v4 = vand.u32 2147483647, %v259_v1  ;;  %v265_v7 = vld [vmem:[#allocation2 + $0x18] sm:$0xff] }
   0xd   :  { %v62_v5 = vand.u32 2147483647, %v261_v3  ;;  %v63_v11 = vand.u32 2147483647, %v265_v7  ;;  %v44_v17 = vld [vmem:[#allocation5] sm:$0xff]  ;;  %v48_v24 = vmax.f32 %v40_v0, 0.0 }
   0xe   :  { %v64_v6 = vsub.f32 0.0, %v60_v2  ;;  %v65_v8 = vsub.f32 0.0, %v61_v4  ;;  %v52_v25 = vmul.f32 %v44_v17, %v40_v0  ;;  %v45_v26 = vld [vmem:[#allocation5 + $0x8] sm:$0xff]  ;;  %v49_v30 = vmax.f32 %v259_v1, 0.0  ;;  %v46_v31 = vld [vmem:[#allocation5 + $0x10] sm:$0xff]  ;;  %v47_v39 = vld [vmem:[#allocation5 + $0x18] sm:$0xff] }
   0xf   :  { %v66_v9 = vsub.f32 0.0, %v62_v5  ;;  %v67_v14 = vsub.f32 0.0, %v63_v11  ;;  %v53_v36 = vmul.f32 %v45_v26, %v259_v1  ;;  %v50_v41 = vmax.f32 %v261_v3, 0.0  ;;  %s125_s1 = sshll.u32 %s237_s0, 4  ;;  %s126_s1 = int_to_ptr.vmem [resolvable:$true] %s125_s1 }
  0x10   :  { %v68_v10 = vmul.f32 1.442695, %v64_v6  ;;  %v70_v12 = vmul.f32 1.442695, %v65_v8  ;;  %v54_v42 = vmul.f32 %v46_v31, %v261_v3  ;;  %v56_v44 = vsub.f32 %v48_v24, %v52_v25 }
  0x11   :  { %v72_v13 = vmul.f32 1.442695, %v66_v9  ;;  %v74_v15 = vmul.f32 1.442695, %v67_v14  ;;  %v51_v46 = vmax.f32 %v265_v7, 0.0  ;;  %v55_v51 = vmul.f32 %v47_v39, %v265_v7 }
  0x12   :  { %141 = vpow2.f32 %v68_v10  ;;  %v57_v55 = vsub.f32 %v49_v30, %v53_v36  ;;  %v58_v59 = vsub.f32 %v50_v41, %v54_v42 }
  0x13   :  { %143 = vpow2.f32 %v70_v12  ;;  %v59_v3 = vsub.f32 %v51_v46, %v55_v51 }
  0x14   :  { %145 = vpow2.f32 %v72_v13 }
  0x15   :  { %147 = vpow2.f32 %v74_v15 }
  0x18   :  { %v142_v16 = vpop.eup %141 }
  0x19   :  { %v144_v18 = vpop.eup %143  ;;  %v76_v19 = vadd.f32 1.0, %v142_v16  ;;  %v79_v20 = vmul.f32 -0.5, %v142_v16  ;;  %v82_v33 = vand.u32 2147483647, %v142_v16 }
  0x1a   :  { %v146_v21 = vpop.eup %145  ;;  %v85_v22 = vadd.f32 1.0, %v144_v18  ;;  %v88_v23 = vmul.f32 -0.5, %v144_v18  ;;  %v91_v37 = vand.u32 2147483647, %v144_v18 }
  0x1b   :  { %149 = vlog2.f32 %v76_v19  ;;  %v94_v27 = vadd.f32 1.0, %v146_v21  ;;  %v148_v28 = vpop.eup %147  ;;  %v80_v29 = vadd.f32 1.0, %v79_v20  ;;  %v97_v32 = vmul.f32 -0.5, %v146_v21 }
  0x1c   :  { %151 = vlog2.f32 %v85_v22  ;;  %v89_v34 = vadd.f32 1.0, %v88_v23  ;;  %v103_v35 = vadd.f32 1.0, %v148_v28  ;;  %v106_v40 = vmul.f32 -0.5, %v148_v28 }
  0x1d   :  { %153 = vlog2.f32 %v94_v27  ;;  %v98_v38 = vadd.f32 1.0, %v97_v32  ;;  %v100_v43 = vand.u32 2147483647, %v146_v21  ;;  %v81_v45 = vmul.f32 %v142_v16, %v80_v29 }
  0x1e   :  { %155 = vlog2.f32 %v103_v35  ;;  %v107_v47 = vadd.f32 1.0, %v106_v40  ;;  %vm273_vm0 = vcmp.lt.f32.partialorder %v82_v33, 0.0004427343  ;;  %v90_v50 = vmul.f32 %v144_v18, %v89_v34 }
  0x1f   :  { %v109_v52 = vand.u32 2147483647, %v148_v28  ;;  %vm92_vm1 = vcmp.lt.f32.partialorder %v91_v37, 0.0004427343  ;;  %v99_v56 = vmul.f32 %v146_v21, %v98_v38  ;;  %vm278_vm2 = vcmp.lt.f32.partialorder %v100_v43, 0.0004427343 }
  0x20   :  { %v108_v63 = vmul.f32 %v148_v28, %v107_v47 }
  0x21   :  { %v150_v48 = vpop.eup %149  ;;  %vm110_vm3 = vcmp.lt.f32.partialorder %v109_v52, 0.0004427343 }
  0x22   :  { %v152_v53 = vpop.eup %151  ;;  %v78_v54 = vmul.f32 0.6931472, %v150_v48 }
  0x23   :  { %v154_v57 = vpop.eup %153  ;;  %v87_v58 = vmul.f32 0.6931472, %v152_v53 }
  0x24   :  { %v84_v61 = vsel %vm273_vm0, %v81_v45, %v78_v54  ;;  %v96_v62 = vmul.f32 0.6931472, %v154_v57  ;;  %v156_v0 = vpop.eup %155 }
  0x25   :  { %v112_v1 = vadd.f32 %v84_v61, %v56_v44  ;;  %v93_v2 = vsel %vm92_vm1, %v90_v50, %v87_v58  ;;  %v105_v6 = vmul.f32 0.6931472, %v156_v0 }
  0x26   :  { %v113_v4 = vadd.f32 %v93_v2, %v57_v55  ;;  %v102_v5 = vsel %vm278_vm2, %v99_v56, %v96_v62 }
  0x27   :  { %116 = vst [vmem:[#allocation7] sm:$0xff] %v112_v1  ;;  %v114_v7 = vadd.f32 %v102_v5, %v58_v59  ;;  %v111_v8 = vsel %vm110_vm3, %v108_v63, %v105_v6 }
  0x28   :  { %117 = vst [vmem:[#allocation7 + $0x8] sm:$0xff] %v113_v4  ;;  %v115_v9 = vadd.f32 %v111_v8, %v59_v3 }
  0x29   :  { %118 = vst [vmem:[#allocation7 + $0x10] sm:$0xff] %v114_v7 }
  0x2a   :  { %119 = vst [vmem:[#allocation7 + $0x18] sm:$0xff] %v115_v9 }
  0x2b   :  { %130 = dma.vmem_to_hbm [thread:$0]  %s126_s1, 512, %s128_s21, [#allocation4]  }
  0x2c   :  { %233 = dma.done.wait [#allocation4], 512  }
  0x2d   :  { %234 = vsyncadd [#allocation4], 4294966784 }
  0x2e   :  { %135 = vsyncpa [#allocation3], 1 }
  0x2f   :  { %136 = vsyncpa [#allocation6], 1 }
  0x30   :  { %137 = vsyncpa [#allocation4], 1 }

</bundles_post_ra>
